<compile_context>
chip_gen: v7x
topology: tpu7x:2x2x1
jax: 0.10.0
libtpu: 0.0.40
codegen_flags: <defaults>
</compile_context>

<pallas_src>
import functools

import jax
import jax.numpy as jnp
from jax.experimental import pallas as pl
from jax.experimental.pallas import tpu as pltpu


def _prenorm_conv1x1_kernel(x_ref, wg_ref, r_ref, b_ref, o_ref, *, eps, inv_c,
                            precision):
    # x_ref : (C, TS)  channels on sublanes, spatial positions dense on lanes
    # wg_ref: (C, C)   gain-folded 1x1-conv weight  W_g[o,i] = w[o,i] * g[i]
    # r_ref : (C, 1)   row sums of W_g (f32)
    # b_ref : (C, 1)   1x1-conv bias (f32)
    x = x_ref[...]
    xf = x.astype(jnp.float32)

    # One-pass LayerNorm statistics over the channel (sublane) axis, in f32.
    s1 = jnp.sum(xf, axis=0, keepdims=True)          # (1, TS)
    s2 = jnp.sum(xf * xf, axis=0, keepdims=True)     # (1, TS)
    mean = s1 * inv_c
    var = jnp.maximum(s2 * inv_c - mean * mean, 0.0)
    inv_std = jax.lax.rsqrt(var + eps)               # (1, TS)

    # fn = pointwise (1x1) conv == channel matmul.  LayerNorm's affine is folded
    # into the epilogue, so the MXU consumes the raw activations:
    #   W_g @ ((x - mean) * inv_std) + b  ==  (W_g @ x - r * mean) * inv_std + b
    z = jnp.dot(wg_ref[...], x, preferred_element_type=jnp.float32,
                precision=precision)                  # (C, TS) f32 accumulation
    y = (z - r_ref[...] * mean) * inv_std + b_ref[...]
    o_ref[...] = y.astype(o_ref.dtype)


def _pick_tile_s(S, C, in_bytes, out_bytes, budget_bytes, lane_cap=1024):
    """Spatial (lane) tile: largest multiple of 128 within the VMEM budget,
    capped at `lane_cap` lanes.  No exact-divisor requirement (partial last
    block is handled by Pallas padding/masking)."""
    if S <= 128:
        return S                                      # full extent is always legal
    # Per-lane VMEM bytes: double-buffered in & out blocks plus ~3 live f32
    # temporaries (xf, x*x / matmul result, epilogue) inside the kernel.
    per_lane = C * (2 * in_bytes + 2 * out_bytes + 3 * 4)
    cap = min(budget_bytes // max(per_lane, 1), lane_cap, S)
    return max((cap // 128) * 128, 128)


def prenorm_pointwise(x, g, w, b, *, vmem_budget_bytes=8 * 2**20):
    """PreNorm(dim, Conv2d(dim, dim, 1)) forward.

    x: (N, C, *spatial) channels-first (NCHW or NCDHW).
    g: (C,) LayerNorm gain.  w: (C, C) 1x1-conv weight (out, in).  b: (C,) bias.
    """
    N, C = int(x.shape[0]), int(x.shape[1])
    S = 1
    for d in x.shape[2:]:
        S *= int(d)
    out_dtype = x.dtype
    in_bytes = x.dtype.itemsize
    out_bytes = jnp.dtype(out_dtype).itemsize
    eps = 1e-5 if x.dtype == jnp.float32 else 1e-3    # matches the torch module

    # Free reshape (merges contiguous trailing dims) -- no transpose, no extra
    # HBM pass.  Channels stay on sublanes, spatial goes dense on lanes.
    x3 = x.reshape(N, C, S)

    # Fold the LayerNorm gain into the conv weight (wrapper-side, f32 math):
    #   W_g[o,i] = w[o,i] * g[i];   r_o = sum_i W_g[o,i]  (consistent with the
    #   dtype actually fed to the MXU).
    wg_f32 = w.astype(jnp.float32) * g.astype(jnp.float32)[None, :]
    wg = wg_f32.astype(w.dtype)
    r = jnp.sum(wg.astype(jnp.float32), axis=1).reshape(C, 1)
    b2 = b.astype(jnp.float32).reshape(C, 1)

    tile_s = _pick_tile_s(S, C, in_bytes, out_bytes, vmem_budget_bytes)
    n_tiles = int(pl.cdiv(S, tile_s))
    # Megacore (v7x has 2 TensorCores per chip): guarantee >= 2 parallel
    # programs when the problem allows splitting.
    if N * n_tiles < 2 and tile_s >= 256:
        tile_s = max(((tile_s // 2) // 128) * 128, 128)
        n_tiles = int(pl.cdiv(S, tile_s))
    grid = (N, n_tiles)

    # f32 params -> exact f32 (multi-pass MXU) to preserve the module's f32
    # semantics; bf16 params -> full-rate single-pass bf16 MXU path.
    precision = (jax.lax.Precision.HIGHEST if wg.dtype == jnp.float32
                 else jax.lax.Precision.DEFAULT)

    kernel = functools.partial(_prenorm_conv1x1_kernel,
                               eps=float(eps), inv_c=1.0 / C,
                               precision=precision)

    # Advisory cost estimate so XLA can schedule surrounding ops around us.
    cost = pl.CostEstimate(
        flops=2 * N * S * C * C + 10 * N * S * C,
        transcendentals=N * S,
        bytes_accessed=N * S * C * (in_bytes + out_bytes)
        + C * C * wg.dtype.itemsize + 8 * C,
    )

    # VMEM: double-buffered x/out blocks + in-kernel f32 temporaries + params.
    # Clamp the limit at 32 MiB so the tiling is safe on v7x (64 MiB physical
    # VMEM, 32 MiB scoped default) as well as on v5e/v6e (128 MiB).
    vmem_need = (C * tile_s * (2 * in_bytes + 2 * out_bytes + 3 * 4)
                 + 2 * C * C * wg.dtype.itemsize + 4 * 2 * C * 4)
    vmem_limit = int(min(max(vmem_need + (4 << 20), 16 << 20), 32 << 20))

    out3 = pl.pallas_call(
        kernel,
        out_shape=jax.ShapeDtypeStruct((N, C, S), out_dtype),
        grid_spec=pltpu.PrefetchScalarGridSpec(
            num_scalar_prefetch=0,
            grid=grid,
            in_specs=[
                # Leading batch dim squeezed out of the kernel ref.
                pl.BlockSpec((None, C, tile_s), lambda n, s: (n, 0, s)),
                pl.BlockSpec((C, C), lambda n, s: (0, 0)),
                pl.BlockSpec((C, 1), lambda n, s: (0, 0)),
                pl.BlockSpec((C, 1), lambda n, s: (0, 0)),
            ],
            out_specs=pl.BlockSpec((None, C, tile_s), lambda n, s: (n, 0, s)),
        ),
        compiler_params=pltpu.CompilerParams(
            dimension_semantics=("parallel", "parallel"),
            vmem_limit_bytes=vmem_limit,
        ),
        cost_estimate=cost,
    )(x3, wg, r, b2)

    return out3.reshape(x.shape)


def prenorm_reference(x, g, w, b):
    """Pure-JAX reference of PreNorm(dim, Conv2d(dim, dim, 1)) forward."""
    xf = x.astype(jnp.float32)
    eps = 1e-5 if x.dtype == jnp.float32 else 1e-3
    mean = jnp.mean(xf, axis=1, keepdims=True)
    var = jnp.mean((xf - mean) ** 2, axis=1, keepdims=True)
    bshape = (1, -1) + (1,) * (x.ndim - 2)
    xn = (xf - mean) * jax.lax.rsqrt(var + eps) * g.astype(jnp.float32).reshape(bshape)
    y = jnp.einsum('nc...,oc->no...', xn, w.astype(jnp.float32),
                   precision=jax.lax.Precision.HIGHEST)
    y = y + b.astype(jnp.float32).reshape(bshape)
    return y.astype(x.dtype)


if __name__ == "__main__":
    key = jax.random.PRNGKey(0)
    kx, kw, kb = jax.random.split(key, 3)

    N, C, H, W = 2, 4, 16, 16
    x = jax.random.normal(kx, (N, C, H, W), dtype=jnp.float32)

    g = jnp.ones((C,), dtype=jnp.float32)                       # LayerNorm gain init
    w = 0.1 * jax.random.normal(kw, (C, C), dtype=jnp.float32)  # 1x1 conv weight
    b = 0.1 * jax.random.normal(kb, (C,), dtype=jnp.float32)    # 1x1 conv bias

    # f32 path (module's f32 semantics; HIGHEST-precision MXU).
    out = jax.block_until_ready(prenorm_pointwise(x, g, w, b))
    ref = prenorm_reference(x, g, w, b)
    assert out.shape == (N, C, H, W)
    assert jnp.allclose(out, ref, atol=2e-3, rtol=2e-3), \
        float(jnp.max(jnp.abs(out - ref)))

    # bf16 path: bf16 params/activations -> full-rate bf16 MXU consuming the
    # raw (un-normalized) x; LN statistics stay f32 in-kernel and eps switches
    # to 1e-3 exactly as in the torch module.
    xb = x.astype(jnp.bfloat16)
    gb = g.astype(jnp.bfloat16)
    wb = w.astype(jnp.bfloat16)
    bb = b.astype(jnp.bfloat16)
    out_bf = jax.block_until_ready(prenorm_pointwise(xb, gb, wb, bb))
    ref_bf = prenorm_reference(xb, gb, wb, bb).astype(jnp.float32)
    assert out_bf.shape == (N, C, H, W)
    assert jnp.allclose(out_bf.astype(jnp.float32), ref_bf, atol=5e-2, rtol=5e-2), \
        float(jnp.max(jnp.abs(out_bf.astype(jnp.float32) - ref_bf)))

    print("KERNEL_OK")
</pallas_src>

<mosaic_0001>
module attributes {stable_mosaic.version = 11 : i64} {
  func.func @_prenorm_conv1x1_kernel(%arg0: i32, %arg1: i32, %arg2: memref<1x4x256xf32, #tpu.memory_space<vmem>>, %arg3: memref<4x4xf32, #tpu.memory_space<vmem>>, %arg4: memref<4x1xf32, #tpu.memory_space<vmem>>, %arg5: memref<4x1xf32, #tpu.memory_space<vmem>>, %arg6: memref<1x4x256xf32, #tpu.memory_space<vmem>>) attributes {dimension_semantics = [#tpu.dimension_semantics<parallel>, #tpu.dimension_semantics<parallel>], iteration_bounds = array<i64: 2, 1>, scalar_prefetch = 0 : i64, scratch_operands = 0 : i64, tpu.core_type = #tpu.core_type<tc>, window_params = [{transform_indices = @transform_0, window_bounds = array<i64: 1, 4, 256>}, {pipeline_mode = #tpu.pipeline_mode<synchronous>, transform_indices = @transform_1, window_bounds = array<i64: 4, 4>}, {pipeline_mode = #tpu.pipeline_mode<synchronous>, transform_indices = @transform_2, window_bounds = array<i64: 4, 1>}, {pipeline_mode = #tpu.pipeline_mode<synchronous>, transform_indices = @transform_3, window_bounds = array<i64: 4, 1>}, {transform_indices = @transform_4, window_bounds = array<i64: 1, 4, 256>}]} {
    %c0 = arith.constant 0 : index
    %c0_0 = arith.constant 0 : index
    %c0_1 = arith.constant 0 : index
    %0 = vector.load %arg2[%c0, %c0_0, %c0_1] : memref<1x4x256xf32, #tpu.memory_space<vmem>>, vector<1x4x256xf32>
    %1 = vector.shape_cast %0 : vector<1x4x256xf32> to vector<4x256xf32>
    %cst = arith.constant dense<0.000000e+00> : vector<256xf32>
    %2 = vector.multi_reduction <add>, %1, %cst [0] : vector<4x256xf32> to vector<256xf32>
    %3 = vector.shape_cast %2 : vector<256xf32> to vector<1x256xf32>
    %4 = arith.mulf %1, %1 : vector<4x256xf32>
    %cst_2 = arith.constant dense<0.000000e+00> : vector<256xf32>
    %5 = vector.multi_reduction <add>, %4, %cst_2 [0] : vector<4x256xf32> to vector<256xf32>
    %6 = vector.shape_cast %5 : vector<256xf32> to vector<1x256xf32>
    %cst_3 = arith.constant 2.500000e-01 : f32
    %7 = vector.broadcast %cst_3 : f32 to vector<1x256xf32>
    %8 = arith.mulf %3, %7 : vector<1x256xf32>
    %cst_4 = arith.constant 2.500000e-01 : f32
    %9 = vector.broadcast %cst_4 : f32 to vector<1x256xf32>
    %10 = arith.mulf %6, %9 : vector<1x256xf32>
    %11 = arith.mulf %8, %8 : vector<1x256xf32>
    %12 = arith.subf %10, %11 : vector<1x256xf32>
    %cst_5 = arith.constant 0.000000e+00 : f32
    %13 = vector.broadcast %cst_5 : f32 to vector<1x256xf32>
    %14 = arith.maximumf %12, %13 : vector<1x256xf32>
    %cst_6 = arith.constant 9.99999974E-6 : f32
    %15 = vector.broadcast %cst_6 : f32 to vector<1x256xf32>
    %16 = arith.addf %14, %15 : vector<1x256xf32>
    %17 = math.rsqrt %16 : vector<1x256xf32>
    %c0_7 = arith.constant 0 : index
    %c0_8 = arith.constant 0 : index
    %18 = vector.load %arg3[%c0_7, %c0_8] : memref<4x4xf32, #tpu.memory_space<vmem>>, vector<4x4xf32>
    %cst_9 = arith.constant dense<0.000000e+00> : vector<4x256xf32>
    %19 = tpu.matmul %18, %1, %cst_9 {dimension_numbers = #tpu.dot_dimension_numbers<[1], [0], [0], [1], [0, 0, 1, 1], [], []>, precision = #tpu.contract_precision<fp32>} : vector<4x4xf32>, vector<4x256xf32>, vector<4x256xf32> -> vector<4x256xf32>
    %c0_10 = arith.constant 0 : index
    %c0_11 = arith.constant 0 : index
    %20 = vector.load %arg4[%c0_10, %c0_11] : memref<4x1xf32, #tpu.memory_space<vmem>>, vector<4x1xf32>
    %21 = vector.broadcast %20 : vector<4x1xf32> to vector<4x256xf32>
    %22 = vector.broadcast %8 : vector<1x256xf32> to vector<4x256xf32>
    %23 = arith.mulf %21, %22 : vector<4x256xf32>
    %24 = arith.subf %19, %23 : vector<4x256xf32>
    %25 = vector.broadcast %17 : vector<1x256xf32> to vector<4x256xf32>
    %26 = arith.mulf %24, %25 : vector<4x256xf32>
    %c0_12 = arith.constant 0 : index
    %c0_13 = arith.constant 0 : index
    %27 = vector.load %arg5[%c0_12, %c0_13] : memref<4x1xf32, #tpu.memory_space<vmem>>, vector<4x1xf32>
    %28 = vector.broadcast %27 : vector<4x1xf32> to vector<4x256xf32>
    %29 = arith.addf %26, %28 : vector<4x256xf32>
    %c0_14 = arith.constant 0 : index
    %c0_15 = arith.constant 0 : index
    %c0_16 = arith.constant 0 : index
    %30 = vector.load %arg6[%c0_14, %c0_15, %c0_16] : memref<1x4x256xf32, #tpu.memory_space<vmem>>, vector<1x4x256xf32>
    %31 = vector.shape_cast %30 : vector<1x4x256xf32> to vector<4x256xf32>
    %32 = vector.shape_cast %29 : vector<4x256xf32> to vector<1x4x256xf32>
    tpu.vector_store %arg6[%c0_14, %c0_15, %c0_16], %32 {strides = array<i32>} : memref<1x4x256xf32, #tpu.memory_space<vmem>>, vector<1x4x256xf32>,
    return
  }
  func.func @transform_0(%arg0: i32, %arg1: i32) -> (i32, i32, i32) {
    %c0_i32 = arith.constant 0 : i32
    %c0_i32_0 = arith.constant 0 : i32
    return %arg0, %c0_i32, %arg1 : i32, i32, i32
  }
  func.func @transform_1(%arg0: i32, %arg1: i32) -> (i32, i32) {
    %c0_i32 = arith.constant 0 : i32
    %c0_i32_0 = arith.constant 0 : i32
    %c0_i32_1 = arith.constant 0 : i32
    return %c0_i32, %c0_i32_0 : i32, i32
  }
  func.func @transform_2(%arg0: i32, %arg1: i32) -> (i32, i32) {
    %c0_i32 = arith.constant 0 : i32
    %c0_i32_0 = arith.constant 0 : i32
    %c0_i32_1 = arith.constant 0 : i32
    return %c0_i32, %c0_i32_0 : i32, i32
  }
  func.func @transform_3(%arg0: i32, %arg1: i32) -> (i32, i32) {
    %c0_i32 = arith.constant 0 : i32
    %c0_i32_0 = arith.constant 0 : i32
    %c0_i32_1 = arith.constant 0 : i32
    return %c0_i32, %c0_i32_0 : i32, i32
  }
  func.func @transform_4(%arg0: i32, %arg1: i32) -> (i32, i32, i32) {
    %c0_i32 = arith.constant 0 : i32
    %c0_i32_0 = arith.constant 0 : i32
    return %arg0, %c0_i32, %arg1 : i32, i32, i32
  }
}

</mosaic_0001>

<bundles_post_ra>
// kernel: tpu_custom_call.1
= control target key start
LH: loop header
LB: loop body
LE: loop exit
PB: predicated region body
PF: predicated region fallthrough
CT: control target
= control target key end

     0   :  { %9 = vsyncpa [#allocation3], 0  ;;  %s1316_s0 = inlined_call_operand.hbm [shape: f32[2,4,256], index: 0, kind: input, shape index: {}]   ;;  %s1317_s1 = inlined_call_operand.vmem [shape: f32[4,4], index: 1, kind: input, shape index: {}]   ;;  %s1318_s2 = inlined_call_operand.vmem [shape: f32[4,1], index: 2, kind: input, shape index: {}]   ;;  %s1319_s3 = inlined_call_operand.vmem [shape: f32[4,1], index: 3, kind: input, shape index: {}]   ;;  %s1320_s4 = inlined_call_operand.hbm [shape: f32[2,4,256], index: 4, kind: output, shape index: {}]  }
   0x1   :  { %11 = vsyncpa [#allocation3 + $0x1], 0 }
   0x2   :  { %12 = vsyncpa [#allocation4], 0 }
   0x3   :  { %14 = vsyncpa [#allocation4 + $0x1], 0  ;;  %s1125_s15 = smov 0   ;;  %s1127_s16 = smov 0  }
   0x4   :  { %s1129_s17 = smov 0   ;;  %s1131_s18 = smov 0  }
   0x5   :  { %s1133_s19 = smov 0   ;;  %s1135_s20 = smov 0  }
   0x6 LB: > { %s885_s21 = sadd.s32 4294967295, %s1094_s20   ;;  %s886_s22 = sadd.s32 4294967294, %s1094_s20   ;;  %s1094_s20 = sphi %s1135_s20, %s20_s20   ;;  %s1090_s19 = sphi %s1133_s19, %s1336_s19   ;;  %s1086_s18 = sphi %s1131_s18, %s1335_s18   ;;  %s1082_s17 = sphi %s1129_s17, %s1334_s17   ;;  %s1078_s16 = sphi %s1127_s16, %s1333_s16   ;;  %s1074_s15 = sphi %s1125_s15, %s1332_s15  }
   0x7   : > { %s32_s23 = sadd.s32 1, %s1090_s19  ;;  %s41_s24 = sadd.s32 1, %s1082_s17 }
   0x8   : > { %p34_p0 = scmp.ge.s32.totalorder %s32_s23, 2  ;;  %p48_p1 = scmp.ne.s32.totalorder %s1082_s17, %s1078_s16 }
   0x9   : > { %p49_p2 = scmp.eq.s32.totalorder %s1094_s20, 0  ;;  %p54_p3 = scmp.ne.s32.totalorder %s1078_s16, %s1074_s15 }
   0xa   : > { %s1338_s23 = smov (%p34_p0, %s32_s23), 0  ;;  %p55_p5 = scmp.eq.s32.totalorder %s885_s21, 0 }
   0xb   : > { %p1166_p4 = por %p49_p2, %p48_p1  ;;  %s36_s26 = ssub.s32 %s1090_s19, %s1338_s23 }
   0xc   : > { %p143_p6 = scmp.eq.s32.totalorder %s885_s21, 1  ;;  %p39_p7 = scmp.eq.s32.totalorder %s36_s26, 0 }
   0xd   : > { %p1172_p8 = por %p55_p5, %p54_p3  ;;  %p149_p10 = scmp.eq.s32.totalorder %s886_s22, 1 }
   0xe   : > { %p1176_p9 = por %p143_p6, %p48_p1  ;;  %p924_p13 = scmp.lt.s32.totalorder %s1094_s20, 2 }
   0xf   : > { %s1181_s29 = scalar_select %p39_p7, %s1082_s17, %s41_s24  }
  0x10   : > { %s1324_s28 = scalar_select %p1176_p9, 1, 0 }
  0x11   : > { %p1183_p11 = por %p149_p10, %p54_p3  ;;  %s178_s5 = sand.u32 1, %s1082_s17  }
  0x12   : > { %s889_s6 = sshll.u32 %s178_s5, 3  ;;  %s900_s7 = sshll.u32 %s1090_s19, 7 }
  0x13   : > { %s1325_s30 = scalar_select %p1183_p11, 1, 0 }
  0x14   : > { %s1194_s10 = scalar_lea.hbm %s1316_s0, %s900_s7  ;;  %s182_s11 = scalar_lea.vmem [#allocation2], %s889_s6 }
  0x15   : > { %s192_s12 = sshll.u32 %s182_s11, 4  ;;  %p1200_p0 = pnand %p924_p13, %p1166_p4  ;;  %s1196_s12 = int_to_ptr.vmem [resolvable:$true] %s192_s12 }
  0x16   : > { %s179_s14 = scalar_lea.sflag [#allocation3], %s178_s5  ;;  %s982_s21 = scalar_lea.hbm %s1194_s10, 128 }
  0x17   : > { %p983_p3 = scmp.ne.s32.totalorder %s1194_s10, %s982_s21  ;;  %p984_p5 = pneg %p1200_p0 }
  0x18   : > { %s987_s25 = scalar_lea.hbm %s1316_s0, 256  ;;  %p988_p4 = scmp.lt.u32.totalorder %s1194_s10, %s1316_s0 }
  0x19   : > { %p985_p6 = pnand %p984_p5, %p983_p3  ;;  %p989_p10 = scmp.lt.u32.totalorder %s987_s25, %s982_s21 }
  0x1a   : > { %p991_p12 = scmp.lt.u32.totalorder %s982_s21, %s1194_s10 }
  0x1b   : > { %p986_p7 = pneg %p985_p6  ;;  %p990_p13 = por %p989_p10, %p988_p4 }
  0x1d   : > { %p992_p1 = por %p991_p12, %p990_p13 }
  0x1f   : > { %p993_p2 = pnand %p992_p1, %p986_p7 }
  0x21   : > { %996 = shalt.err (!%p993_p2)
}
  0x22   : > { %s997_s5 = scalar_lea.vmem %s1196_s12, 128  ;;  %s1096_s7 = smov [#allocation2]  }
  0x23   : > { %p998_p3 = scmp.ne.s32.totalorder %s1196_s12, %s997_s5  ;;  %s1002_s8 = sshll.u32 %s1096_s7, 4  ;;  %s1003_s8 = int_to_ptr.vmem [resolvable:$false] %s1002_s8 }
  0x24   : > { %s1004_s9 = scalar_lea.vmem %s1003_s8, 256  ;;  %p1005_p9 = scmp.lt.s32.totalorder %s1196_s12, %s1003_s8 }
  0x25   : > { %p1000_p6 = pnand %p998_p3, %p984_p5  ;;  %p1006_p4 = scmp.lt.s32.totalorder %s1004_s9, %s997_s5 }
  0x27   : > { %p1001_p11 = pneg %p1000_p6  ;;  %p1007_p10 = por %p1006_p4, %p1005_p9 }
  0x29   : > { %p1008_p12 = pnand %p1007_p10, %p1001_p11 }
  0x2b   : > { %1011 = shalt.err (!%p1008_p12)
}
  0x2c   : > { %919 = dma.hbm_to_vmem [thread:$0]  (!%p1200_p0), %s1194_s10, 128, %s1196_s12, %s179_s14  }
  0x2d   : > { %p1327_p1 = scmp.lt.s32.totalorder %s1094_s20, 3  ;;  %p1328_p2 = scmp.ge.s32.totalorder %s1094_s20, 1 }
  0x2f   : > { %p198_p5 = pnand %p1328_p2, %p1327_p1 }
  0x30   : > { %s1236_s11 = sand.u32 (!%p198_p5), 1, %s1078_s16  }
  0x31   : > { %201 = sbr.rel (%p198_p5) target bundleno = 323 (0x143), region = 36  ;;  %s893_s21 = sshll.u32 (!%p198_p5), %s1236_s11, 3 }
  0x32   : > { %s204_s22 = scalar_lea.sflag (!%p198_p5), [#allocation3], %s1236_s11  ;;  %s207_s13 = scalar_lea.vmem (!%p198_p5), [#allocation2], %s893_s21 }
  0x38   : > { %1065 = dma.done.wait (%p1172_p8), %s204_s22, 128  }
  0x39   : > { %1067 = vsyncadd (%p1172_p8), %s204_s22, 4294967168  ;;  %v1097_v0 = vmov 0.0   ;;  %v1098_v1 = vmov 0   ;;  %vm238_vm0 = vcmask 1043456   ;;  %vm286_vm1 = vcmask 31744   ;;  %v234_v2 = vld [vmem:[%s207_s13] sm:$0xff] }
  0x3a   : > { %597 = vmatprep.mubr.f32.mxu0 %v1097_v0  ;;  %360 = vmatprep.mubr.f32.mxu1 %v1097_v0  ;;  %v285_v3 = vld [vmem:[%s1317_s1] sm:$0xf]  ;;  %v236_v5 = vcombine.high %v234_v2, %v234_v2  ;;  %v290_v6 = vsel %vm238_vm0, %v234_v2, 0  ;;  %v253_v25 = vmul.f32 %v234_v2, %v234_v2  ;;  %v239_v26 = vsel %vm238_vm0, %v234_v2, 0.0  ;;  %s901_s26 = sshll.u32 %s1086_s18, 7  ;;  %s231_s6 = scalar_lea.vmem [#allocation5], %s893_s21 }
  0x3b   : > { %976 = vset.pattern.permute.xlu0 %v1098_v1  ;;  %v759_v4 = vld [vmem:[%s1318_s2] sm:$0xf]  ;;  %v288_v7 = vsel %vm286_vm1, %v285_v3, 0  ;;  %v296_v8 = vand.u32 4294901760, %v290_v6  ;;  %v240_v29 = vrot.slane %v239_v26, 4  ;;  %s801_s5 = sshll.u32 %s231_s6, 4  ;;  %s1267_s9 = scalar_lea.hbm %s1320_s4, %s901_s26  ;;  %s1269_s5 = int_to_ptr.vmem [resolvable:$true] %s801_s5 }
  0x3c   : > { %762 = vperm.xlu0 %976, %v759_v4   ;;  %v361_v9 = vand.u32 4294901760, %v288_v7  ;;  %v771_v10 = vld [vmem:[%s1319_s3] sm:$0xf]  ;;  %v292_v11 = vsel %vm238_vm0, %v236_v5, 0  ;;  %v246_v27 = vsel %vm238_vm0, %v236_v5, 0.0  ;;  %v255_v28 = vcombine.high %v253_v25, %v253_v25  ;;  %s785_s22 = scalar_lea.sflag [#allocation4], %s1236_s11 }
  0x3d   : > { %v294_v12 = vand.u32 4294901760, %v292_v11  ;;  %v379_v13 = vsub.f32 %v290_v6, %v296_v8  ;;  %v247_v30 = vrot.slane %v246_v27, 4  ;;  %v257_v31 = vsel %vm238_vm0, %v253_v25, 0.0  ;;  %s1012_s13 = scalar_lea.vmem %s1269_s5, 128  ;;  %p1329_p9 = scmp.ne.s32.totalorder %s1324_s28, 0 }
  0x3e   : > { %v362_v14 = vsub.f32 %v288_v7, %v361_v9  ;;  %v264_v32 = vsel %vm238_vm0, %v255_v28, 0.0  ;;  %v241_v33 = vadd.f32 %v240_v29, %v239_v26  ;;  %v258_v34 = vrot.slane %v257_v31, 4  ;;  %p1013_p8 = scmp.ne.s32.totalorder %s1269_s5, %s1012_s13  ;;  %s1099_s18 = smov [#allocation5]  }
  0x3f   : > { %532 = vmatprep.subr.mxu0 %v294_v12  ;;  %295 = vmatprep.subr.mxu1 %v294_v12  ;;  %v373_v16 = vsub.f32 %v292_v11, %v294_v12  ;;  %v380_v17 = vand.u32 4294901760, %v379_v13  ;;  %v248_v35 = vadd.f32 %v247_v30, %v246_v27  ;;  %v265_v36 = vrot.slane %v264_v32, 4  ;;  %s1016_s21 = sshll.u32 %s1099_s18, 4  ;;  %s1017_s21 = int_to_ptr.vmem [resolvable:$false] %s1016_s21 }
  0x40   : > { %774 = vperm.xlu0 %976, %v771_v10   ;;  %v363_v15 = vand.u32 4294901760, %v362_v14  ;;  %534 = vmatpush1.msra.mxu0 %v296_v8  ;;  %v242_v37 = vrot.slane %v241_v33, 2  ;;  %v259_v38 = vadd.f32 %v258_v34, %v257_v31  ;;  %p1014_p11 = pnand %p1013_p8, %p1329_p9  ;;  %s1018_s10 = scalar_lea.vmem %s1017_s21, 256 }
  0x41   : > { %297 = vmatpush1.msra.mxu1 %v296_v8  ;;  %v374_v19 = vand.u32 4294901760, %v373_v16  ;;  %v381_v20 = vsub.f32 %v379_v13, %v380_v17  ;;  %v249_v39 = vrot.slane %v248_v35, 2  ;;  %v266_v40 = vadd.f32 %v265_v36, %v264_v32  ;;  %p1019_p7 = scmp.lt.s32.totalorder %s1269_s5, %s1017_s21  ;;  %p1020_p13 = scmp.lt.s32.totalorder %s1018_s10, %s1012_s13 }
  0x42   : > { %601 = vmatmul.mubr.f32.vlgmr.msra.gmra.mrb[0].mxu0 %v363_v15  ;;  %v364_v18 = vsub.f32 %v362_v14, %v363_v15  ;;  %v243_v41 = vadd.f32 %v242_v37, %v241_v33  ;;  %v260_v42 = vrot.slane %v259_v38, 2  ;;  %p1015_p0 = pneg %p1014_p11 }
  0x43   : > { %677 = vmatprep.mubr.f32.mxu0 %v1097_v0  ;;  %v375_v22 = vsub.f32 %v373_v16, %v374_v19  ;;  %610 = vmatprep.subr.mxu0 %v374_v19  ;;  %v382_v23 = vand.u32 4294901760, %v381_v20  ;;  %v250_v43 = vadd.f32 %v249_v39, %v248_v35  ;;  %v267_v44 = vrot.slane %v266_v40, 2  ;;  %p1021_p3 = por %p1020_p13, %p1019_p7 }
  0x44   : > { %v365_v21 = vand.u32 4294901760, %v364_v18  ;;  %614 = vmatpush1.msra.mxu0 %v380_v17  ;;  %v244_v45 = vrot.slane %v243_v41, 1  ;;  %v261_v46 = vadd.f32 %v260_v42, %v259_v38 }
  0x45   : > { %v376_v24 = vand.u32 4294901760, %v375_v22  ;;  %686 = vmatprep.subr.mxu0 %v294_v12  ;;  %v251_v47 = vrot.slane %v250_v43, 1  ;;  %v268_v48 = vadd.f32 %v267_v44, %v266_v40  ;;  %p1022_p6 = pnand %p1021_p3, %p1015_p0 }
  0x46   : > { %366 = vmatmul.mubr.f32.vlgmr.msra.gmra.mrb[0].mxu1 %v365_v21  ;;  %v245_v49 = vadd.f32 %v244_v45, %v243_v41  ;;  %v262_v50 = vrot.slane %v261_v46, 1 }
  0x47   : > { %446 = vmatprep.mubr.f32.mxu1 %v1097_v0  ;;  %377 = vmatprep.subr.mxu1 %v376_v24  ;;  %v252_v51 = vadd.f32 %v251_v47, %v250_v43  ;;  %v269_v52 = vrot.slane %v268_v48, 1 }
  0x48   : > { %383 = vmatpush1.msra.mxu1 %v382_v23  ;;  %v263_v53 = vadd.f32 %v262_v50, %v261_v46  ;;  %v271_v54 = vmul.f32 0.25, %v245_v49 }
  0x49   : > { %456 = vmatprep.subr.mxu1 %v373_v16  ;;  %v270_v55 = vadd.f32 %v269_v52, %v268_v48  ;;  %v272_v56 = vmul.f32 0.25, %v252_v51 }
  0x4a   : > { %679 = vmatmul.mubr.f32.vlgmr.msra.gmra.mrb[0].mxu0 %v361_v9  ;;  %v273_v57 = vmul.f32 0.25, %v263_v53  ;;  %v275_v58 = vmul.f32 %v271_v54, %v271_v54 }
  0x4b   : > { %688 = vmatpush1.msra.mxu0 %v296_v8  ;;  %751 = vmatprep.mubr.f32.mxu0 %v1097_v0  ;;  %v274_v59 = vmul.f32 0.25, %v270_v55  ;;  %v276_v60 = vmul.f32 %v272_v56, %v272_v56 }
  0x4c   : > { %v277_v61 = vsub.f32 %v273_v57, %v275_v58 }
  0x4d   : > { %v278_v62 = vsub.f32 %v274_v59, %v276_v60 }
  0x4e   : > { %448 = vmatmul.mubr.f32.vlgmr.msra.gmra.mrb[0].mxu1 %v361_v9  ;;  %v279_v63 = vmax.f32 %v277_v61, 0.0 }
  0x4f   : > { %459 = vmatpush1.msra.mxu1 %v379_v13  ;;  %522 = vmatprep.mubr.f32.mxu1 %v1097_v0  ;;  %v280_v0 = vmax.f32 %v278_v62, 0.0 }
  0x50   : > { %v281_v1 = vadd.f32 1e-05, %v279_v63 }
  0x51   : > { %v282_v2 = vadd.f32 1e-05, %v280_v0 }
  0x52   : > { %753 = vmatmul.mubr.f32.vlgmr.msra.gmra.mrb[0].mxu0 %v361_v9  ;;  %978 = vrsqrt.f32 %v281_v1 }
  0x53   : > { %980 = vrsqrt.f32 %v282_v2 }
  0x56   : > { %525 = vmatmul.mubr.f32.vlgmr.msra.gmra.mrb[0].mxu1 %v362_v14 }
  0x5c   : > { %v979_v11 = vpop.eup %978 }
  0x5d   : > { %v981_v13 = vpop.eup %980 }
  0xbb   : > { %v763_v5 = vpop.permute.xlu0 %762 }
  0xbc   : > { %v765_v6 = vmul.f32 %v763_v5, %v271_v54  ;;  %v766_v7 = vmul.f32 %v763_v5, %v272_v56 }
  0xbf   : > { %v775_v17 = vpop.permute.xlu0 %774 }
 0x125   : > { %v754_v3 = vpop.f32.mrb[0].mxu0 }
 0x126   : > { %v756_v4 = vpop.f32.mrb[1].mxu0 }
 0x129   : > { %v526_v8 = vpop.f32.mrb[0].mxu1 }
 0x12a   : > { %v902_v9 = vadd.f32 %v754_v3, %v526_v8  ;;  %v528_v10 = vpop.f32.mrb[1].mxu1 }
 0x12b   : > { %v903_v12 = vadd.f32 %v756_v4, %v528_v10 }
 0x12c   : > { %v767_v14 = vsub.f32 %v902_v9, %v765_v6 }
 0x12d   : > { %v768_v15 = vsub.f32 %v903_v12, %v766_v7 }
 0x12e   : > { %v769_v16 = vmul.f32 %v979_v11, %v767_v14 }
 0x12f   : > { %v770_v18 = vmul.f32 %v981_v13, %v768_v15 }
 0x130   : > { %v777_v19 = vadd.f32 %v775_v17, %v769_v16 }
 0x131   : > { %v778_v20 = vadd.f32 %v775_v17, %v770_v18 }
 0x133   : > { %v781_v21 = vcombine.low %v777_v19, %v778_v20 }
 0x135   : > { %783 = vst [vmem:[%s231_s6] sm:$0xff] %v781_v21 }
 0x136   : > { %1025 = shalt.err (!%p1022_p6)
}
 0x137   : > { %s1026_s11 = scalar_lea.hbm %s1267_s9, 128  ;;  %s1030_s24 = scalar_lea.hbm %s1320_s4, 256 }
 0x138   : > { %p1027_p4 = scmp.ne.s32.totalorder %s1267_s9, %s1026_s11  ;;  %p1031_p1 = scmp.lt.u32.totalorder %s1267_s9, %s1320_s4 }
 0x139   : > { %p1032_p2 = scmp.lt.u32.totalorder %s1030_s24, %s1026_s11  ;;  %p1034_p8 = scmp.lt.u32.totalorder %s1026_s11, %s1267_s9 }
 0x13a   : > { %p1028_p10 = pnand %p1027_p4, %p1329_p9 }
 0x13b   : > { %p1033_p5 = por %p1032_p2, %p1031_p1 }
 0x13c   : > { %p1029_p12 = pneg %p1028_p10 }
 0x13d   : > { %p1035_p11 = por %p1034_p8, %p1033_p5 }
 0x13f   : > { %p1036_p0 = pnand %p1035_p11, %p1029_p12 }
 0x141   : > { %1039 = shalt.err (!%p1036_p0)
}
 0x142   : > { %914 = dma.vmem_to_hbm [thread:$0]  (%p1329_p9), %s1269_s5, 128, %s1267_s9, %s785_s22  }
 0x143 PF: > { %s813_s26 = sand.u32 1, %s1074_s15   ;;  %p1330_p7 = scmp.ne.s32.totalorder %s1325_s30, 0 }
 0x144   : > { %p1331_p13 = scmp.ge.s32.totalorder %s1094_s20, 2  ;;  %s814_s6 = scalar_lea.sflag [#allocation4], %s813_s26 }
 0x146   : > { %p921_p3 = pnand %p1331_p13, %p1330_p7 }
 0x148   : > { %1069 = dma.done.wait (!%p921_p3), %s814_s6, 128  }
 0x149   : > { %1071 = vsyncadd (!%p921_p3), %s814_s6, 4294967168  ;;  %s20_s20 = sadd.s32 1, %s1094_s20   ;;  %s1332_s15 = smov %s1078_s16 }
 0x14a   : > { %p17_p6 = scmp.ge.s32.totalorder %s20_s20, 4   ;;  %s1333_s16 = smov %s1082_s17 }
 0x14b   : > { %s1334_s17 = smov %s1181_s29  ;;  %s1335_s18 = smov %s1090_s19 }
 0x14c   : > { %s1336_s19 = smov %s1338_s23  ;;  %19 = sbr.rel (!%p17_p6) target bundleno = 6 (0x6), region = 81 }
 0x153   :  { %819 = vsyncpa [#allocation3], 1 }
 0x154   :  { %821 = vsyncpa [#allocation3 + $0x1], 1 }
 0x155   :  { %822 = vsyncpa [#allocation4], 1 }
 0x156   :  { %824 = vsyncpa [#allocation4 + $0x1], 1 }

</bundles_post_ra>
